<compile_context>
chip_gen: v6e
topology: v6e:2x2x1
jax: 0.10.0
libtpu: 0.0.40
codegen_flags: <defaults>
</compile_context>

<pallas_src>
import functools

import jax
import jax.numpy as jnp
from jax.experimental import pallas as pl
from jax.experimental.pallas import tpu as pltpu

IN_DIM, H_DIM, OUT_DIM = 71, 5, 1
PAD = 128  # lane-aligned padding for the (tiny) hidden dims


def _round_up(n, m):
    return ((n + m - 1) // m) * m


def _pad2(a, rows, cols):
    r, c = a.shape
    return jnp.pad(a, ((0, rows - r), (0, cols - c)))


def _mlp_kernel(x_ref, w1_ref, b1_ref, w2_ref, b2_ref, w3_ref, b3_ref, o_ref):
    mm_dtype = w1_ref.dtype                                  # bf16 (default) or f32 fallback
    x = x_ref[...].astype(mm_dtype)                          # (TILE_B, 71) unpadded features
    # layer 1 (MXU): relu(x @ W1 + b1); W1 zero-padded to (71, 128), f32 accumulation.
    h1 = jnp.dot(x, w1_ref[...], preferred_element_type=jnp.float32) + b1_ref[...]
    h1 = jnp.maximum(h1, 0.0)                                # (TILE_B, 128); padded lanes == 0
    # layer 2 (MXU): relu(h1 @ W2 + b2); W2 zero-padded to (128, 128) so K=128 is exact.
    h2 = jnp.dot(h1.astype(mm_dtype), w2_ref[...],
                 preferred_element_type=jnp.float32) + b2_ref[...]
    h2 = jnp.maximum(h2, 0.0)                                # (TILE_B, 128); padded lanes == 0
    # layer 3 off the MXU (OUT_DIM == 1): VPU multiply + XLU lane-reduce, all f32.
    z = jnp.sum(h2 * w3_ref[...], axis=-1, keepdims=True) + b3_ref[...]   # (TILE_B, 1)
    o_ref[...] = jax.nn.sigmoid(z)


def prepare_params(params, matmul_dtype=jnp.bfloat16):
    """One-time padding / dtype prep of weights & biases (hoisted out of the call path).

    matmul_dtype=jnp.bfloat16 (default) gives the fast MXU path (~1e-2 parity);
    matmul_dtype=jnp.float32 keeps exact 1e-5 parity with the PyTorch reference.
    """
    w1, b1, w2, b2, w3, b3 = params
    w1_p = _pad2(jnp.asarray(w1, jnp.float32), IN_DIM, PAD).astype(matmul_dtype)  # (71, 128)
    w2_p = _pad2(jnp.asarray(w2, jnp.float32), PAD, PAD).astype(matmul_dtype)     # (128, 128)
    b1_p = _pad2(jnp.asarray(b1, jnp.float32)[None, :], 1, PAD)                   # (1, 128) f32
    b2_p = _pad2(jnp.asarray(b2, jnp.float32)[None, :], 1, PAD)                   # (1, 128) f32
    # Layer 3 stays off the MXU: w3 as an f32 row vector + (1, 1) bias.
    w3_row = _pad2(jnp.asarray(w3, jnp.float32).T, OUT_DIM, PAD)                  # (1, 128) f32
    b3_p = jnp.asarray(b3, jnp.float32).reshape(OUT_DIM, OUT_DIM)                 # (1, 1)  f32
    return (w1_p, b1_p, w2_p, b2_p, w3_row, b3_p)


def _choose_tile(batch, tile_b):
    """Batch-tile selection: >=2 grid steps for large batches (v7x has 2 TCs and the grid is
    sharded across them), >=1024 rows/step (~0.35us fixed per-step cost), <= tile_b (VMEM)."""
    tile_b = max(8, _round_up(tile_b, 8))
    b8 = _round_up(batch, 8)
    if b8 <= min(tile_b, 1024):
        return b8                                            # one small block, grid=(1,)
    tile = max(2048, _round_up(-(-batch // 8), 8))           # aim for ~8 steps, floor 2048
    tile = min(tile, max(1024, _round_up(-(-b8 // 2), 8)))   # but always >= 2 grid steps
    return int(min(tile_b, tile))


@functools.partial(jax.jit, static_argnames=("tile_b",))
def mlp_forward(x, prepared, tile_b=4096):
    """x: [B, IN_DIM] float32 -> [B, OUT_DIM] float32."""
    w1_p, b1_p, w2_p, b2_p, w3_p, b3_p = prepared
    x = x.astype(jnp.float32)
    B = x.shape[0]
    tile = _choose_tile(B, tile_b)
    grid = (pl.cdiv(B, tile),)

    resident = lambda shape: pl.BlockSpec(shape, lambda i: (0, 0))  # stays in VMEM

    return pl.pallas_call(
        _mlp_kernel,
        out_shape=jax.ShapeDtypeStruct((B, OUT_DIM), jnp.float32),
        grid=grid,
        in_specs=[
            pl.BlockSpec((tile, IN_DIM), lambda i: (i, 0)),   # x, unpadded features
            resident((IN_DIM, PAD)), resident((1, PAD)),      # W1 (mm dtype), b1 (f32)
            resident((PAD, PAD)), resident((1, PAD)),         # W2 (mm dtype), b2 (f32)
            resident((OUT_DIM, PAD)), resident((OUT_DIM, OUT_DIM)),  # w3 row, b3 (f32)
        ],
        out_specs=pl.BlockSpec((tile, OUT_DIM), lambda i: (i, 0)),
        compiler_params=pltpu.CompilerParams(
            dimension_semantics=("parallel",),                # batch axis -> both TCs on v7x
            vmem_limit_bytes=32 * 1024 * 1024,                # explicit; v5e default is 16 MiB
        ),
    )(x, w1_p, b1_p, w2_p, b2_p, w3_p, b3_p)


def init_params(key):
    """Deterministic init matching nn.Linear's U(-1/sqrt(fan_in), 1/sqrt(fan_in))."""
    ks = jax.random.split(key, 6)

    def linear(kw, kb, fan_in, fan_out):
        bound = 1.0 / jnp.sqrt(jnp.float32(fan_in))
        # stored as [in, out] == torch W.T
        w = jax.random.uniform(kw, (fan_in, fan_out), jnp.float32, -bound, bound)
        b = jax.random.uniform(kb, (fan_out,), jnp.float32, -bound, bound)
        return w, b

    w1, b1 = linear(ks[0], ks[1], IN_DIM, H_DIM)
    w2, b2 = linear(ks[2], ks[3], H_DIM, H_DIM)
    w3, b3 = linear(ks[4], ks[5], H_DIM, OUT_DIM)
    return (w1, b1, w2, b2, w3, b3)


def mlp_reference(x, params):
    w1, b1, w2, b2, w3, b3 = params
    h1 = jax.nn.relu(x @ w1 + b1)
    h2 = jax.nn.relu(h1 @ w2 + b2)
    return jax.nn.sigmoid(h2 @ w3 + b3)


if __name__ == "__main__":
    key = jax.random.PRNGKey(0)
    k_param, k_x1, k_x2, k_x3, k_x4 = jax.random.split(key, 5)
    params = init_params(k_param)
    prepared_bf16 = prepare_params(params)                    # fast path (bf16 MXU, f32 acc)
    prepared_f32 = prepare_params(params, jnp.float32)        # exact-parity fallback

    # small batch, single tile -- bf16 fast path (~1e-2 parity) and f32 fallback (1e-5 parity)
    B = 8
    x = jax.random.normal(k_x1, (B, IN_DIM), jnp.float32)
    ref = mlp_reference(x, params)
    out = jax.block_until_ready(mlp_forward(x, prepared_bf16))
    assert out.shape == (B, OUT_DIM), out.shape
    assert jnp.allclose(out, ref, atol=2e-2), float(jnp.max(jnp.abs(out - ref)))
    out_f32 = jax.block_until_ready(mlp_forward(x, prepared_f32))
    assert jnp.allclose(out_f32, ref, atol=1e-5, rtol=1e-5), float(jnp.max(jnp.abs(out_f32 - ref)))

    # multi-step grid (exercises double-buffered batch tiling)
    x32 = jax.random.normal(k_x2, (32, IN_DIM), jnp.float32)
    out32 = jax.block_until_ready(mlp_forward(x32, prepared_bf16, tile_b=8))
    assert jnp.allclose(out32, mlp_reference(x32, params), atol=2e-2)

    # ragged batch (exercises partial last block, masked output store)
    x13 = jax.random.normal(k_x3, (13, IN_DIM), jnp.float32)
    out13 = jax.block_until_ready(mlp_forward(x13, prepared_bf16, tile_b=8))
    assert out13.shape == (13, OUT_DIM)
    assert jnp.allclose(out13, mlp_reference(x13, params), atol=2e-2)

    # default tiling path: batch large enough that _choose_tile picks >=2 grid steps
    x2k = jax.random.normal(k_x4, (2048, IN_DIM), jnp.float32)
    out2k = jax.block_until_ready(mlp_forward(x2k, prepared_bf16))
    assert jnp.allclose(out2k, mlp_reference(x2k, params), atol=2e-2)

    print("KERNEL_OK")
</pallas_src>

<mosaic_0001>
module attributes {stable_mosaic.version = 11 : i64} {
  func.func @_mlp_kernel(%arg0: i32, %arg1: memref<8x71xf32, #tpu.memory_space<vmem>>, %arg2: memref<71x128xbf16, #tpu.memory_space<vmem>>, %arg3: memref<1x128xf32, #tpu.memory_space<vmem>>, %arg4: memref<128x128xbf16, #tpu.memory_space<vmem>>, %arg5: memref<1x128xf32, #tpu.memory_space<vmem>>, %arg6: memref<1x128xf32, #tpu.memory_space<vmem>>, %arg7: memref<1x1xf32, #tpu.memory_space<vmem>>, %arg8: memref<8x1xf32, #tpu.memory_space<vmem>>) attributes {dimension_semantics = [#tpu.dimension_semantics<parallel>], iteration_bounds = array<i64: 1>, scalar_prefetch = 0 : i64, scratch_operands = 0 : i64, tpu.core_type = #tpu.core_type<tc>, window_params = [{transform_indices = @transform_0, window_bounds = array<i64: 8, 71>}, {pipeline_mode = #tpu.pipeline_mode<synchronous>, transform_indices = @transform_1, window_bounds = array<i64: 71, 128>}, {pipeline_mode = #tpu.pipeline_mode<synchronous>, transform_indices = @transform_2, window_bounds = array<i64: 1, 128>}, {pipeline_mode = #tpu.pipeline_mode<synchronous>, transform_indices = @transform_3, window_bounds = array<i64: 128, 128>}, {pipeline_mode = #tpu.pipeline_mode<synchronous>, transform_indices = @transform_4, window_bounds = array<i64: 1, 128>}, {pipeline_mode = #tpu.pipeline_mode<synchronous>, transform_indices = @transform_5, window_bounds = array<i64: 1, 128>}, {pipeline_mode = #tpu.pipeline_mode<synchronous>, transform_indices = @transform_6, window_bounds = array<i64: 1, 1>}, {transform_indices = @transform_7, window_bounds = array<i64: 8, 1>}]} {
    %c0 = arith.constant 0 : index
    %c0_0 = arith.constant 0 : index
    %0 = vector.load %arg1[%c0, %c0_0] : memref<8x71xf32, #tpu.memory_space<vmem>>, vector<8x71xf32>
    %1 = arith.truncf %0 : vector<8x71xf32> to vector<8x71xbf16>
    %c0_1 = arith.constant 0 : index
    %c0_2 = arith.constant 0 : index
    %2 = vector.load %arg2[%c0_1, %c0_2] : memref<71x128xbf16, #tpu.memory_space<vmem>>, vector<71x128xbf16>
    %cst = arith.constant dense<0.000000e+00> : vector<8x128xf32>
    %3 = tpu.matmul %1, %2, %cst {dimension_numbers = #tpu.dot_dimension_numbers<[1], [0], [0], [1], [0, 0, 1, 1], [], []>} : vector<8x71xbf16>, vector<71x128xbf16>, vector<8x128xf32> -> vector<8x128xf32>
    %c0_3 = arith.constant 0 : index
    %c0_4 = arith.constant 0 : index
    %4 = vector.load %arg3[%c0_3, %c0_4] : memref<1x128xf32, #tpu.memory_space<vmem>>, vector<1x128xf32>
    %5 = vector.broadcast %4 : vector<1x128xf32> to vector<8x128xf32>
    %6 = arith.addf %3, %5 : vector<8x128xf32>
    %cst_5 = arith.constant 0.000000e+00 : f32
    %7 = vector.broadcast %cst_5 : f32 to vector<8x128xf32>
    %8 = arith.maximumf %6, %7 : vector<8x128xf32>
    %9 = arith.truncf %8 : vector<8x128xf32> to vector<8x128xbf16>
    %c0_6 = arith.constant 0 : index
    %c0_7 = arith.constant 0 : index
    %10 = vector.load %arg4[%c0_6, %c0_7] : memref<128x128xbf16, #tpu.memory_space<vmem>>, vector<128x128xbf16>
    %cst_8 = arith.constant dense<0.000000e+00> : vector<8x128xf32>
    %11 = tpu.matmul %9, %10, %cst_8 {dimension_numbers = #tpu.dot_dimension_numbers<[1], [0], [0], [1], [0, 0, 1, 1], [], []>} : vector<8x128xbf16>, vector<128x128xbf16>, vector<8x128xf32> -> vector<8x128xf32>
    %c0_9 = arith.constant 0 : index
    %c0_10 = arith.constant 0 : index
    %12 = vector.load %arg5[%c0_9, %c0_10] : memref<1x128xf32, #tpu.memory_space<vmem>>, vector<1x128xf32>
    %13 = vector.broadcast %12 : vector<1x128xf32> to vector<8x128xf32>
    %14 = arith.addf %11, %13 : vector<8x128xf32>
    %cst_11 = arith.constant 0.000000e+00 : f32
    %15 = vector.broadcast %cst_11 : f32 to vector<8x128xf32>
    %16 = arith.maximumf %14, %15 : vector<8x128xf32>
    %c0_12 = arith.constant 0 : index
    %c0_13 = arith.constant 0 : index
    %17 = vector.load %arg6[%c0_12, %c0_13] : memref<1x128xf32, #tpu.memory_space<vmem>>, vector<1x128xf32>
    %18 = vector.broadcast %17 : vector<1x128xf32> to vector<8x128xf32>
    %19 = arith.mulf %16, %18 : vector<8x128xf32>
    %cst_14 = arith.constant dense<0.000000e+00> : vector<8xf32>
    %20 = vector.multi_reduction <add>, %19, %cst_14 [1] : vector<8x128xf32> to vector<8xf32>
    %21 = vector.shape_cast %20 : vector<8xf32> to vector<8x1xf32>
    %c0_15 = arith.constant 0 : index
    %c0_16 = arith.constant 0 : index
    %22 = vector.load %arg7[%c0_15, %c0_16] : memref<1x1xf32, #tpu.memory_space<vmem>>, vector<1x1xf32>
    %23 = vector.broadcast %22 : vector<1x1xf32> to vector<8x1xf32>
    %24 = arith.addf %21, %23 : vector<8x1xf32>
    %25 = arith.negf %24 : vector<8x1xf32>
    %26 = math.exp %25 : vector<8x1xf32>
    %cst_17 = arith.constant 1.000000e+00 : f32
    %27 = vector.broadcast %cst_17 : f32 to vector<8x1xf32>
    %28 = arith.addf %27, %26 : vector<8x1xf32>
    %29 = arith.divf %27, %28 : vector<8x1xf32>
    %c0_18 = arith.constant 0 : index
    %c0_19 = arith.constant 0 : index
    %30 = vector.load %arg8[%c0_18, %c0_19] : memref<8x1xf32, #tpu.memory_space<vmem>>, vector<8x1xf32>
    tpu.vector_store %arg8[%c0_18, %c0_19], %29 {strides = array<i32>} : memref<8x1xf32, #tpu.memory_space<vmem>>, vector<8x1xf32>,
    return
  }
  func.func @transform_0(%arg0: i32) -> (i32, i32) {
    %c0_i32 = arith.constant 0 : i32
    %c0_i32_0 = arith.constant 0 : i32
    return %arg0, %c0_i32 : i32, i32
  }
  func.func @transform_1(%arg0: i32) -> (i32, i32) {
    %c0_i32 = arith.constant 0 : i32
    %c0_i32_0 = arith.constant 0 : i32
    %c0_i32_1 = arith.constant 0 : i32
    return %c0_i32, %c0_i32_0 : i32, i32
  }
  func.func @transform_2(%arg0: i32) -> (i32, i32) {
    %c0_i32 = arith.constant 0 : i32
    %c0_i32_0 = arith.constant 0 : i32
    %c0_i32_1 = arith.constant 0 : i32
    return %c0_i32, %c0_i32_0 : i32, i32
  }
  func.func @transform_3(%arg0: i32) -> (i32, i32) {
    %c0_i32 = arith.constant 0 : i32
    %c0_i32_0 = arith.constant 0 : i32
    %c0_i32_1 = arith.constant 0 : i32
    return %c0_i32, %c0_i32_0 : i32, i32
  }
  func.func @transform_4(%arg0: i32) -> (i32, i32) {
    %c0_i32 = arith.constant 0 : i32
    %c0_i32_0 = arith.constant 0 : i32
    %c0_i32_1 = arith.constant 0 : i32
    return %c0_i32, %c0_i32_0 : i32, i32
  }
  func.func @transform_5(%arg0: i32) -> (i32, i32) {
    %c0_i32 = arith.constant 0 : i32
    %c0_i32_0 = arith.constant 0 : i32
    %c0_i32_1 = arith.constant 0 : i32
    return %c0_i32, %c0_i32_0 : i32, i32
  }
  func.func @transform_6(%arg0: i32) -> (i32, i32) {
    %c0_i32 = arith.constant 0 : i32
    %c0_i32_0 = arith.constant 0 : i32
    %c0_i32_1 = arith.constant 0 : i32
    return %c0_i32, %c0_i32_0 : i32, i32
  }
  func.func @transform_7(%arg0: i32) -> (i32, i32) {
    %c0_i32 = arith.constant 0 : i32
    %c0_i32_0 = arith.constant 0 : i32
    return %arg0, %c0_i32 : i32, i32
  }
}

</mosaic_0001>

<bundles_post_ra>
// kernel: mlp_forward.1
= control target key start
LH: loop header
LB: loop body
LE: loop exit
PB: predicated region body
PF: predicated region fallthrough
CT: control target
= control target key end

     0   :  { %s539_s0 = inlined_call_operand.hbm [shape: f32[8,71], index: 0, kind: input, shape index: {}]   ;;  %s540_s1 = inlined_call_operand.hbm [shape: bf16[71,128], index: 1, kind: input, shape index: {}]   ;;  %s541_s2 = inlined_call_operand.vmem [shape: f32[1,128], index: 2, kind: input, shape index: {}]   ;;  %s542_s3 = inlined_call_operand.hbm [shape: bf16[128,128], index: 3, kind: input, shape index: {}]   ;;  %s543_s4 = inlined_call_operand.vmem [shape: f32[1,128], index: 4, kind: input, shape index: {}]   ;;  %s544_s5 = inlined_call_operand.vmem [shape: f32[1,128], index: 5, kind: input, shape index: {}]   ;;  %s545_s6 = inlined_call_operand.<no memory space> [shape: f32[1,1], index: 6, kind: input, shape index: {}]   ;;  %s546_s7 = inlined_call_operand.vmem [shape: f32[8,1], index: 7, kind: output, shape index: {}]  }
   0x1   :  { %v12_v0 = vstv %s545_s6 }
   0x2   :  { %13 = vst [vmem:[#allocation2] sm:$0x1] %v12_v0 }
   0x3   :  { %14 = vsyncpa [#allocation4], 0 }
   0x4   :  { %15 = vsyncpa [#allocation6], 0  ;;  %s467_s26 = smov [#allocation5]  }
   0x5   :  { %s31_s27 = sshll.u32 %s467_s26, 4  ;;  %s32_s27 = int_to_ptr.vmem [resolvable:$true] %s31_s27 }
   0x6   :  { %s411_s28 = scalar_lea.vmem %s32_s27, 576  ;;  %p416_p1 = scmp.lt.s32.totalorder %s32_s27, %s32_s27 }
   0x7   :  { %p412_p0 = scmp.ne.s32.totalorder %s32_s27, %s411_s28  ;;  %p417_p2 = scmp.lt.s32.totalorder %s411_s28, %s411_s28 }
   0x9   :  { %p418_p3 = por %p417_p2, %p416_p1 }
   0xb   :  { %p419_p4 = pnand %p418_p3, %p412_p0 }
   0xd   :  { %422 = shalt.err (!%p419_p4)
}
   0xe   :  { %s468_s29 = smov 64   ;;  %s469_s30 = smov 4  }
   0xf   :  { %37 = dma.hbm_to_vmem [thread:$0]  %s540_s1, 576, %s32_s27, [#allocation6], %s468_s29, %s468_s29, %s469_s30  }
  0x10   :  { %s470_s6 = smov [#allocation3]   ;;  %s471_s11 = smov [#allocation7]  }
  0x11   :  { %s22_s10 = sshll.u32 %s470_s6, 4  ;;  %s45_s12 = sshll.u32 %s471_s11, 4  ;;  %s23_s10 = int_to_ptr.vmem [resolvable:$true] %s22_s10  ;;  %s46_s12 = int_to_ptr.vmem [resolvable:$true] %s45_s12 }
  0x12   :  { %s431_s13 = scalar_lea.vmem %s23_s10, 128  ;;  %p436_p6 = scmp.lt.s32.totalorder %s23_s10, %s23_s10 }
  0x13   :  { %p432_p5 = scmp.ne.s32.totalorder %s23_s10, %s431_s13  ;;  %p437_p7 = scmp.lt.s32.totalorder %s431_s13, %s431_s13 }
  0x15   :  { %p438_p8 = por %p437_p7, %p436_p6 }
  0x17   :  { %p439_p9 = pnand %p438_p8, %p432_p5 }
  0x19   :  { %442 = shalt.err (!%p439_p9)
}
  0x1a   :  { %25 = dma.hbm_to_vmem [thread:$0]  %s539_s0, 128, %s23_s10, [#allocation4]  }
  0x1b   :  { %s451_s16 = scalar_lea.vmem %s46_s12, 1024  ;;  %p456_p11 = scmp.lt.s32.totalorder %s46_s12, %s46_s12 }
  0x1c   :  { %p452_p10 = scmp.ne.s32.totalorder %s46_s12, %s451_s16  ;;  %p457_p12 = scmp.lt.s32.totalorder %s451_s16, %s451_s16 }
  0x1e   :  { %p458_p13 = por %p457_p12, %p456_p11 }
  0x20   :  { %p459_p0 = pnand %p458_p13, %p452_p10 }
  0x22   :  { %462 = shalt.err (!%p459_p0)
}
  0x23   :  { %51 = dma.hbm_to_vmem [thread:$0]  %s542_s3, 1024, %s46_s12, [#allocation6], %s468_s29, %s468_s29, %s469_s30  }
  0x24   :  { %463 = dma.done.wait [#allocation4], 128  }
  0x25   :  { %464 = vsyncadd [#allocation4], 4294967168 }
  0x26   :  { %465 = dma.done.wait [#allocation6], 1600  }
  0x27   :  { %466 = vsyncadd [#allocation6], 4294965696  ;;  %vm117_vm0 = vcmask 1042432   ;;  %v472_v1 = vmov 0.0   ;;  %vm473_vm1 = vmmov 0   ;;  %vm118_vm2 = vcmask 1043456  }
  0x28   :  { %344 = vmatprep.subr.bf16.mxu0 %v472_v1  ;;  %358 = vmatprep.subr.bf16.mxu1 %v472_v1  ;;  %v474_v2 = vmov 65535   ;;  %v386_v5 = vld [vmem:[#allocation5 + $0x20] ss:$0 sps:$4 sm:$0xff]   ;;  %v387_v7 = vld [vmem:[#allocation5 + $0x18] sm:$0xff]   ;;  %v388_v10 = vld [vmem:[#allocation5 + $0x10] sm:$0xff]   ;;  %vm113_vm3 = vcmask 580608  }
  0x29   :  { %354 = vmatprep.mubr.msk.bf16.mxu0 %vm473_vm1, %v472_v1  ;;  %374 = vmatprep.mubr.msk.bf16.mxu1 %vm473_vm1, %v472_v1  ;;  %v119_v3 = vsel %vm117_vm0, 4294967295, %v474_v2  ;;  %v391_v8 = vld [vmem:[#allocation7 + $0x38] sm:$0xff]   ;;  %v392_v9 = vld [vmem:[#allocation7 + $0x30] sm:$0xff]   ;;  %v393_v11 = vld [vmem:[#allocation7 + $0x28] sm:$0xff]   ;;  %vm302_vm4 = vcmask 7168  }
  0x2a   :  { %v120_v4 = vsel %vm118_vm2, %v119_v3, 0  ;;  %359 = vmatpush3.bf16.msra.mxu1 %v391_v8  ;;  %v389_v12 = vld [vmem:[#allocation5 + $0x8] sm:$0xff]   ;;  %v390_v14 = vld [vmem:[#allocation5] sm:$0xff]   ;;  %v68_v15 = vld [vmem:[#allocation3] sm:$0xff] }
  0x2b   :  { %v122_v6 = vand.u32 %v386_v5, %v120_v4  ;;  %360 = vmatprep.subr.bf16.mxu1 %v472_v1  ;;  %v394_v13 = vld [vmem:[#allocation7 + $0x20] sm:$0xff]   ;;  %v69_v16 = vpack.c.bf16 %v68_v15, %v68_v15  ;;  %v395_v17 = vld [vmem:[#allocation7 + $0x18] sm:$0xff]   ;;  %v396_v18 = vld [vmem:[#allocation7 + $0x10] sm:$0xff]  }
  0x2c   :  { %v397_v19 = vld [vmem:[#allocation7 + $0x8] sm:$0xff]   ;;  %v398_v20 = vld [vmem:[#allocation7] sm:$0xff]   ;;  %v310_v21 = vld [vmem:[%s541_s2] ss:$0 sm:$0xff] }
  0x2d   :  { %345 = vmatpush3.bf16.msra.mxu0 %v122_v6  ;;  %v317_v29 = vld [vmem:[%s543_s4] ss:$0 sm:$0xff] }
  0x2e   :  { %346 = vmatprep.subr.bf16.mxu0 %v472_v1  ;;  %361 = vmatpush3.bf16.msra.mxu1 %v392_v9  ;;  %v326_v33 = vld [vmem:[%s544_s5] ss:$0 sm:$0xff] }
  0x2f   :  { %362 = vmatprep.subr.bf16.mxu1 %v472_v1  ;;  %v327_v38 = vld [vmem:[#allocation2] ss:$0 sm:$0xff] }
  0x31   :  { %347 = vmatpush3.bf16.msra.mxu0 %v387_v7 }
  0x32   :  { %348 = vmatprep.subr.bf16.mxu0 %v472_v1  ;;  %363 = vmatpush3.bf16.msra.mxu1 %v393_v11 }
  0x33   :  { %364 = vmatprep.subr.bf16.mxu1 %v472_v1 }
  0x35   :  { %349 = vmatpush3.bf16.msra.mxu0 %v388_v10 }
  0x36   :  { %350 = vmatprep.subr.bf16.mxu0 %v472_v1  ;;  %365 = vmatpush3.bf16.msra.mxu1 %v394_v13 }
  0x37   :  { %366 = vmatprep.subr.bf16.mxu1 %v472_v1 }
  0x39   :  { %351 = vmatpush3.bf16.msra.mxu0 %v389_v12 }
  0x3a   :  { %352 = vmatprep.subr.bf16.mxu0 %v472_v1  ;;  %367 = vmatpush3.bf16.msra.mxu1 %v395_v17 }
  0x3b   :  { %368 = vmatprep.subr.bf16.mxu1 %v472_v1 }
  0x3d   :  { %353 = vmatpush3.bf16.msra.mxu0 %v390_v14 }
  0x3e   :  { %369 = vmatpush3.bf16.msra.mxu1 %v396_v18 }
  0x3f   :  { %370 = vmatprep.subr.bf16.mxu1 %v472_v1 }
  0x40   :  { %355 = vmatmul.mubr.msk.bf16.vlgmr.msra.gmra.mxu0 %vm113_vm3, %v69_v16 }
  0x42   :  { %371 = vmatpush3.bf16.msra.mxu1 %v397_v19 }
  0x43   :  { %372 = vmatprep.subr.bf16.mxu1 %v472_v1 }
  0x46   :  { %373 = vmatpush3.bf16.msra.mxu1 %v398_v20 }
 0x100   :  { %v158_v22 = vpop.f32.mrf.mxu0 }
 0x101   :  { %v159_v23 = vadd.f32 %v310_v21, %v158_v22 }
 0x102   :  { %v356_v24 = vpop.f32.mrf.mxu0 }
 0x103   :  { %v164_v25 = vmax.f32 %v159_v23, 0.0 }
 0x104   :  { %v161_v26 = vpop.f32.mrf.mxu0 }
 0x105   :  { %v165_v27 = vpack.c.bf16 %v164_v25, %v164_v25 }
 0x106   :  { %v357_v28 = vpop.f32.mrf.mxu0 }
 0x107   :  { %375 = vmatmul.mubr.bf16.vlgmr.msra.gmra.mxu1 %v165_v27 }
 0x1c7   :  { %v271_v30 = vpop.f32.mrf.mxu1 }
 0x1c8   :  { %v272_v31 = vadd.f32 %v317_v29, %v271_v30 }
 0x1c9   :  { %v376_v32 = vpop.f32.mrf.mxu1 }
 0x1ca   :  { %v277_v34 = vmax.f32 %v272_v31, 0.0 }
 0x1cb   :  { %v274_v35 = vpop.f32.mrf.mxu1 }
 0x1cc   :  { %v285_v36 = vmul.f32 %v326_v33, %v277_v34 }
 0x1cd   :  { %v377_v37 = vpop.f32.mrf.mxu1 }
 0x1ce   :  { %286 = vadd.xlane.f32.xlu0 %v285_v36 }
 0x257   :  { %v287_v39 = vpop.xlane.xlu0 %286 }
 0x258   :  { %v295_v40 = vadd.f32 %v327_v38, %v287_v39 }
 0x25a   :  { %v328_v41 = vmul.f32 -1.442695, %v295_v40 }
 0x25c   :  { %399 = vpow2.f32 %v328_v41 }
 0x269   :  { %v400_v42 = vpop.eup %399 }
 0x26a   :  { %v299_v43 = vadd.f32 1.0, %v400_v42 }
 0x26c   :  { %401 = vrcp.f32 %v299_v43 }
 0x279   :  { %v402_v44 = vpop.eup %401 }
 0x27a   :  { %303 = vst.msk [vmem:[%s546_s7] sm:$0xff] %vm302_vm4, %v402_v44 }
 0x27b   :  { %308 = vsyncpa [#allocation4], 1 }
 0x27c   :  { %309 = vsyncpa [#allocation6], 1 }

</bundles_post_ra>
